<compile_context>
chip_gen: v6e
topology: v6e:2x2x1
jax: 0.10.0
libtpu: 0.0.40
codegen_flags: <defaults>
</compile_context>

<pallas_src>
import jax
import jax.numpy as jnp
from jax.experimental import pallas as pl
from jax.experimental.pallas import tpu as pltpu


HIDDEN = 512
LANE = 128
SUBLANE = 8
MAX_TILE_B = 512        # batch rows per grid step
MIN_SPLIT_TILE_B = 128  # only split into >=2 tiles if each keeps >=128 rows


def _round_up(x, m):
    return ((x + m - 1) // m) * m


def _cdiv(a, b):
    return -(-a // b)


def _pick_tile_b(B):
    """Choose the batch-tile size (rows per grid step).

    - As large as possible up to MAX_TILE_B, multiple of 8 (sublane).
    - Split into >= 2 tiles whenever each tile can still keep >= 128 rows so
      dimension_semantics=("parallel",) can shard tiles over v7x's two TCs.
    - Tiles are sized to roughly evenly cover B (minimal masked remainder).
    """
    n_tiles = max(1, _cdiv(B, MAX_TILE_B))
    tile = _round_up(_cdiv(B, n_tiles), SUBLANE)
    if n_tiles == 1:
        half = _round_up(_cdiv(B, 2), SUBLANE)
        if half >= MIN_SPLIT_TILE_B:
            tile = half
    return tile


# ----------------------------------------------------------------------------
# Kernels
# ----------------------------------------------------------------------------
def _encoder_kernel(x_ref, w1_ref, b1_ref, w2_ref, b2_ref, o_ref):
    """Fused Linear -> ReLU -> Linear; output is the lane-padded latent."""
    x = x_ref[...].astype(w1_ref.dtype)
    h = jnp.dot(x, w1_ref[...], preferred_element_type=jnp.float32) + b1_ref[...]
    h = jnp.maximum(h, 0.0)                                   # ReLU(inplace=True)
    z = jnp.dot(h.astype(w2_ref.dtype), w2_ref[...],
                preferred_element_type=jnp.float32) + b2_ref[...]
    o_ref[...] = z.astype(o_ref.dtype)


def _autoencoder_kernel(x_ref, ew1_ref, eb1_ref, ew2_ref, eb2_ref,
                        dw1_ref, db1_ref, dw2_ref, db2_ref, o_ref):
    """Fully fused encoder+decoder; latent stays VMEM/vreg resident."""
    x = x_ref[...].astype(ew1_ref.dtype)
    h = jnp.dot(x, ew1_ref[...], preferred_element_type=jnp.float32) + eb1_ref[...]
    h = jnp.maximum(h, 0.0)
    z = jnp.dot(h.astype(ew2_ref.dtype), ew2_ref[...],
                preferred_element_type=jnp.float32) + eb2_ref[...]
    # decoder (no HBM write/read of z, no second kernel launch)
    h2 = jnp.dot(z.astype(dw1_ref.dtype), dw1_ref[...],
                 preferred_element_type=jnp.float32) + db1_ref[...]
    h2 = jnp.maximum(h2, 0.0)
    y = jnp.dot(h2.astype(dw2_ref.dtype), dw2_ref[...],
                preferred_element_type=jnp.float32) + db2_ref[...]
    o_ref[...] = y.astype(o_ref.dtype)


# ----------------------------------------------------------------------------
# Wrapper: batch-tiled pallas_call with VMEM-resident (single-buffered) weights
# ----------------------------------------------------------------------------
def _fused_mlp_call(kernel, x, params, out_dim, *, flops):
    """Runs `kernel` over a batch grid.

    x: (B, Din) f32 activations (pipelined per batch tile, default 2 buffers).
    params: weights/biases -- full-array blocks, constant index_map, single
            buffer (Buffered(1)): DMA'd once, resident across all grid steps.
    """
    B, d_in = x.shape
    tile_b = _pick_tile_b(B)
    n_tiles = _cdiv(B, tile_b)

    in_specs = [pl.BlockSpec((tile_b, d_in), lambda i: (i, 0))]
    for p in params:
        in_specs.append(
            pl.BlockSpec(p.shape, lambda i: (0, 0), pipeline_mode=pl.Buffered(1)))

    # Explicit scoped-VMEM budget: double-buffered activation I/O tiles +
    # single-buffered weights + in-kernel f32 temps + headroom; clamp to
    # 48 MiB so the budget fits v7x's 64 MiB physical VMEM.
    io_bytes = tile_b * (d_in * x.dtype.itemsize + out_dim * 4) * 2
    w_bytes = sum(int(p.size) * p.dtype.itemsize for p in params)
    tmp_bytes = tile_b * (HIDDEN + max(out_dim, LANE)) * 4 * 2
    vmem_limit = int(min(max(io_bytes + w_bytes + tmp_bytes + (4 << 20),
                             32 << 20), 48 << 20))

    bytes_accessed = (x.size * x.dtype.itemsize + w_bytes + B * out_dim * 4)
    cost = pl.CostEstimate(
        flops=int(flops), transcendentals=0, bytes_accessed=int(bytes_accessed)
    )

    return pl.pallas_call(
        kernel,
        out_shape=jax.ShapeDtypeStruct((B, out_dim), jnp.float32),
        grid=(n_tiles,),
        in_specs=in_specs,
        out_specs=pl.BlockSpec((tile_b, out_dim), lambda i: (i, 0)),
        compiler_params=pltpu.CompilerParams(
            dimension_semantics=("parallel",),   # v7x: shard batch tiles over 2 TCs
            vmem_limit_bytes=vmem_limit,
        ),
        cost_estimate=cost,
    )(x, *params)


# ----------------------------------------------------------------------------
# Model
# ----------------------------------------------------------------------------
class AutoencoderPallas:
    """JAX/Pallas port of the PyTorch Autoencoder (forward pass only)."""

    def __init__(self, input_size, encode_size, key, weight_dtype=jnp.bfloat16):
        self.input_size = input_size
        self.encode_size = encode_size
        # lane-dense internal latent width (kernel-internal layout only)
        self.enc_pad = max(LANE, _round_up(encode_size, LANE))
        ks = jax.random.split(key, 8)

        def init_linear(kw, kb, fan_in, fan_out):
            # mimics torch.nn.Linear's uniform(-1/sqrt(fan_in), +1/sqrt(fan_in))
            bound = 1.0 / jnp.sqrt(jnp.float32(fan_in))
            w = jax.random.uniform(kw, (fan_in, fan_out), jnp.float32, -bound, bound)
            b = jax.random.uniform(kb, (fan_out,), jnp.float32, -bound, bound)
            return w, b

        e_w1, e_b1 = init_linear(ks[0], ks[1], input_size, HIDDEN)
        e_w2, e_b2 = init_linear(ks[2], ks[3], HIDDEN, encode_size)
        d_w1, d_b1 = init_linear(ks[4], ks[5], encode_size, HIDDEN)
        d_w2, d_b2 = init_linear(ks[6], ks[7], HIDDEN, input_size)

        # zero-pad latent dim to 128 lanes (pads contribute exactly 0 to outputs)
        pad = self.enc_pad - encode_size
        e_w2 = jnp.pad(e_w2, ((0, 0), (0, pad)))
        e_b2 = jnp.pad(e_b2, ((0, pad),))
        d_w1 = jnp.pad(d_w1, ((0, pad), (0, 0)))

        # bf16 weights (halve weight DMA, native MXU rate); f32 (1, N) biases
        self.e_w1 = e_w1.astype(weight_dtype)
        self.e_b1 = e_b1.reshape(1, -1)
        self.e_w2 = e_w2.astype(weight_dtype)
        self.e_b2 = e_b2.reshape(1, -1)
        self.d_w1 = d_w1.astype(weight_dtype)
        self.d_b1 = d_b1.reshape(1, -1)
        self.d_w2 = d_w2.astype(weight_dtype)
        self.d_b2 = d_b2.reshape(1, -1)

    # --- pallas-backed paths ------------------------------------------------
    def encoder(self, x):
        # NOTE: at tiny B (e.g. 8 rows) this path is launch/DMA-latency bound;
        # batch requests upstream when possible -- structural wins here only
        # pay off once B reaches a few hundred rows.
        B = x.shape[0]
        flops = 2 * B * (self.input_size * HIDDEN + HIDDEN * self.enc_pad)
        z_pad = _fused_mlp_call(
            _encoder_kernel, x,
            (self.e_w1, self.e_b1, self.e_w2, self.e_b2),
            self.enc_pad, flops=flops,
        )
        return z_pad[:, : self.encode_size]

    def forward(self, x, train=False):
        if not train:
            return self.encoder(x)
        B = x.shape[0]
        flops = 2 * B * (
            self.input_size * HIDDEN + HIDDEN * self.enc_pad
            + self.enc_pad * HIDDEN + HIDDEN * self.input_size
        )
        return _fused_mlp_call(
            _autoencoder_kernel, x,
            (self.e_w1, self.e_b1, self.e_w2, self.e_b2,
             self.d_w1, self.d_b1, self.d_w2, self.d_b2),
            self.input_size, flops=flops,
        )


# ----------------------------------------------------------------------------
# Pure-JAX reference (same numerics: bf16 weights/activations, f32 accumulate)
# ----------------------------------------------------------------------------
def _reference_forward(model, x, train=False):
    def linear(a, w, b):
        return jnp.dot(a.astype(w.dtype), w,
                       preferred_element_type=jnp.float32) + b

    h = jnp.maximum(linear(x, model.e_w1, model.e_b1), 0.0)
    z = linear(h, model.e_w2, model.e_b2)          # (B, enc_pad), pads are 0
    if not train:
        return z[:, : model.encode_size]
    h2 = jnp.maximum(linear(z, model.d_w1, model.d_b1), 0.0)
    return linear(h2, model.d_w2, model.d_b2)


if __name__ == "__main__":
    key = jax.random.PRNGKey(0)
    k_param, k_x1, k_x2 = jax.random.split(key, 3)

    INPUT_SIZE = 256    # feature dim
    ENCODE_SIZE = 32    # latent dim
    BATCH_SMALL = 8     # single grid step, launch-latency bound
    BATCH_LARGE = 300   # 2 tiles of 152 rows (megacore path + masked last block)

    model = AutoencoderPallas(INPUT_SIZE, ENCODE_SIZE, k_param)

    for batch, kx in ((BATCH_SMALL, k_x1), (BATCH_LARGE, k_x2)):
        x = jax.random.normal(kx, (batch, INPUT_SIZE), dtype=jnp.float32)

        # Inference path: forward(x, train=False) == encoder(x)
        z = jax.block_until_ready(model.forward(x, train=False))
        assert z.shape == (batch, ENCODE_SIZE), z.shape

        # Training path: forward(x, train=True) == decoder(encoder(x)), one fused kernel
        y = jax.block_until_ready(model.forward(x, train=True))
        assert y.shape == (batch, INPUT_SIZE), y.shape

        # Correctness vs. pure-JAX reference (same bf16 weights / f32 accumulation)
        z_ref = _reference_forward(model, x, train=False)
        y_ref = _reference_forward(model, x, train=True)
        assert jnp.allclose(z, z_ref, atol=1e-2, rtol=1e-2), \
            float(jnp.max(jnp.abs(z - z_ref)))
        assert jnp.allclose(y, y_ref, atol=1e-2, rtol=1e-2), \
            float(jnp.max(jnp.abs(y - y_ref)))

    print("KERNEL_OK")
</pallas_src>

<mosaic_0001>
module attributes {stable_mosaic.version = 11 : i64} {
  func.func @_encoder_kernel(%arg0: i32, %arg1: memref<8x256xf32, #tpu.memory_space<vmem>>, %arg2: memref<256x512xbf16, #tpu.memory_space<vmem>>, %arg3: memref<1x512xf32, #tpu.memory_space<vmem>>, %arg4: memref<512x128xbf16, #tpu.memory_space<vmem>>, %arg5: memref<1x128xf32, #tpu.memory_space<vmem>>, %arg6: memref<8x128xf32, #tpu.memory_space<vmem>>) attributes {dimension_semantics = [#tpu.dimension_semantics<parallel>], iteration_bounds = array<i64: 1>, scalar_prefetch = 0 : i64, scratch_operands = 0 : i64, tpu.core_type = #tpu.core_type<tc>, window_params = [{transform_indices = @transform_0, window_bounds = array<i64: 8, 256>}, {pipeline_mode = #tpu.pipeline_mode<synchronous>, transform_indices = @transform_1, window_bounds = array<i64: 256, 512>}, {pipeline_mode = #tpu.pipeline_mode<synchronous>, transform_indices = @transform_2, window_bounds = array<i64: 1, 512>}, {pipeline_mode = #tpu.pipeline_mode<synchronous>, transform_indices = @transform_3, window_bounds = array<i64: 512, 128>}, {pipeline_mode = #tpu.pipeline_mode<synchronous>, transform_indices = @transform_4, window_bounds = array<i64: 1, 128>}, {transform_indices = @transform_5, window_bounds = array<i64: 8, 128>}]} {
    %c0 = arith.constant 0 : index
    %c0_0 = arith.constant 0 : index
    %0 = vector.load %arg1[%c0, %c0_0] : memref<8x256xf32, #tpu.memory_space<vmem>>, vector<8x256xf32>
    %1 = arith.truncf %0 : vector<8x256xf32> to vector<8x256xbf16>
    %c0_1 = arith.constant 0 : index
    %c0_2 = arith.constant 0 : index
    %2 = vector.load %arg2[%c0_1, %c0_2] : memref<256x512xbf16, #tpu.memory_space<vmem>>, vector<256x512xbf16>
    %cst = arith.constant dense<0.000000e+00> : vector<8x512xf32>
    %3 = tpu.matmul %1, %2, %cst {dimension_numbers = #tpu.dot_dimension_numbers<[1], [0], [0], [1], [0, 0, 1, 1], [], []>} : vector<8x256xbf16>, vector<256x512xbf16>, vector<8x512xf32> -> vector<8x512xf32>
    %c0_3 = arith.constant 0 : index
    %c0_4 = arith.constant 0 : index
    %4 = vector.load %arg3[%c0_3, %c0_4] : memref<1x512xf32, #tpu.memory_space<vmem>>, vector<1x512xf32>
    %5 = vector.broadcast %4 : vector<1x512xf32> to vector<8x512xf32>
    %6 = arith.addf %3, %5 : vector<8x512xf32>
    %cst_5 = arith.constant 0.000000e+00 : f32
    %7 = vector.broadcast %cst_5 : f32 to vector<8x512xf32>
    %8 = arith.maximumf %6, %7 : vector<8x512xf32>
    %9 = arith.truncf %8 : vector<8x512xf32> to vector<8x512xbf16>
    %c0_6 = arith.constant 0 : index
    %c0_7 = arith.constant 0 : index
    %10 = vector.load %arg4[%c0_6, %c0_7] : memref<512x128xbf16, #tpu.memory_space<vmem>>, vector<512x128xbf16>
    %cst_8 = arith.constant dense<0.000000e+00> : vector<8x128xf32>
    %11 = tpu.matmul %9, %10, %cst_8 {dimension_numbers = #tpu.dot_dimension_numbers<[1], [0], [0], [1], [0, 0, 1, 1], [], []>} : vector<8x512xbf16>, vector<512x128xbf16>, vector<8x128xf32> -> vector<8x128xf32>
    %c0_9 = arith.constant 0 : index
    %c0_10 = arith.constant 0 : index
    %12 = vector.load %arg5[%c0_9, %c0_10] : memref<1x128xf32, #tpu.memory_space<vmem>>, vector<1x128xf32>
    %13 = vector.broadcast %12 : vector<1x128xf32> to vector<8x128xf32>
    %14 = arith.addf %11, %13 : vector<8x128xf32>
    %c0_11 = arith.constant 0 : index
    %c0_12 = arith.constant 0 : index
    %15 = vector.load %arg6[%c0_11, %c0_12] : memref<8x128xf32, #tpu.memory_space<vmem>>, vector<8x128xf32>
    tpu.vector_store %arg6[%c0_11, %c0_12], %14 {strides = array<i32>} : memref<8x128xf32, #tpu.memory_space<vmem>>, vector<8x128xf32>,
    return
  }
  func.func @transform_0(%arg0: i32) -> (i32, i32) {
    %c0_i32 = arith.constant 0 : i32
    %c0_i32_0 = arith.constant 0 : i32
    return %arg0, %c0_i32 : i32, i32
  }
  func.func @transform_1(%arg0: i32) -> (i32, i32) {
    %c0_i32 = arith.constant 0 : i32
    %c0_i32_0 = arith.constant 0 : i32
    %c0_i32_1 = arith.constant 0 : i32
    return %c0_i32, %c0_i32_0 : i32, i32
  }
  func.func @transform_2(%arg0: i32) -> (i32, i32) {
    %c0_i32 = arith.constant 0 : i32
    %c0_i32_0 = arith.constant 0 : i32
    %c0_i32_1 = arith.constant 0 : i32
    return %c0_i32, %c0_i32_0 : i32, i32
  }
  func.func @transform_3(%arg0: i32) -> (i32, i32) {
    %c0_i32 = arith.constant 0 : i32
    %c0_i32_0 = arith.constant 0 : i32
    %c0_i32_1 = arith.constant 0 : i32
    return %c0_i32, %c0_i32_0 : i32, i32
  }
  func.func @transform_4(%arg0: i32) -> (i32, i32) {
    %c0_i32 = arith.constant 0 : i32
    %c0_i32_0 = arith.constant 0 : i32
    %c0_i32_1 = arith.constant 0 : i32
    return %c0_i32, %c0_i32_0 : i32, i32
  }
  func.func @transform_5(%arg0: i32) -> (i32, i32) {
    %c0_i32 = arith.constant 0 : i32
    %c0_i32_0 = arith.constant 0 : i32
    return %arg0, %c0_i32 : i32, i32
  }
}

</mosaic_0001>

<bundles_post_ra>
// kernel: tpu_custom_call.1
= control target key start
LH: loop header
LB: loop body
LE: loop exit
PB: predicated region body
PF: predicated region fallthrough
CT: control target
= control target key end

     0   :  { %10 = vsyncpa [#allocation3], 0  ;;  %s1377_s0 = inlined_call_operand.hbm [shape: f32[8,256], index: 0, kind: input, shape index: {}]   ;;  %s1378_s1 = inlined_call_operand.hbm [shape: bf16[256,512], index: 1, kind: input, shape index: {}]   ;;  %s1379_s2 = inlined_call_operand.hbm [shape: f32[1,512], index: 2, kind: input, shape index: {}]   ;;  %s1380_s3 = inlined_call_operand.hbm [shape: bf16[512,128], index: 3, kind: input, shape index: {}]   ;;  %s1381_s4 = inlined_call_operand.vmem [shape: f32[1,128], index: 4, kind: input, shape index: {}]   ;;  %s1382_s5 = inlined_call_operand.hbm [shape: f32[8,128], index: 5, kind: output, shape index: {}]  }
   0x1   :  { %11 = vsyncpa [#allocation6], 0 }
   0x2   :  { %12 = vsyncpa [#allocation9], 0 }
   0x3   :  { %13 = vsyncpa [#allocation4], 0  ;;  %s1320_s18 = smov [#allocation5]  }
   0x4   :  { %s29_s19 = sshll.u32 %s1320_s18, 4  ;;  %s30_s19 = int_to_ptr.vmem [resolvable:$true] %s29_s19 }
   0x5   :  { %s1220_s20 = scalar_lea.vmem %s30_s19, 8192  ;;  %p1225_p1 = scmp.lt.s32.totalorder %s30_s19, %s30_s19 }
   0x6   :  { %p1221_p0 = scmp.ne.s32.totalorder %s30_s19, %s1220_s20  ;;  %p1226_p2 = scmp.lt.s32.totalorder %s1220_s20, %s1220_s20 }
   0x8   :  { %p1227_p3 = por %p1226_p2, %p1225_p1 }
   0xa   :  { %p1228_p4 = pnand %p1227_p3, %p1221_p0 }
   0xc   :  { %1231 = shalt.err (!%p1228_p4)
}
   0xd   :  { %s1321_s21 = smov 256   ;;  %s1322_s22 = smov 16  }
   0xe   :  { %35 = dma.hbm_to_vmem [thread:$0]  %s1378_s1, 8192, %s30_s19, [#allocation6], %s1321_s21, %s1321_s21, %s1322_s22  }
   0xf   :  { %s1323_s25 = smov [#allocation2]   ;;  %s1324_s27 = smov [#allocation7]  }
  0x10   :  { %s20_s26 = sshll.u32 %s1323_s25, 4  ;;  %s42_s28 = sshll.u32 %s1324_s27, 4  ;;  %s21_s26 = int_to_ptr.vmem [resolvable:$true] %s20_s26  ;;  %s43_s28 = int_to_ptr.vmem [resolvable:$true] %s42_s28 }
  0x11   :  { %s1240_s29 = scalar_lea.vmem %s21_s26, 256  ;;  %p1245_p6 = scmp.lt.s32.totalorder %s21_s26, %s21_s26 }
  0x12   :  { %p1241_p5 = scmp.ne.s32.totalorder %s21_s26, %s1240_s29  ;;  %p1246_p7 = scmp.lt.s32.totalorder %s1240_s29, %s1240_s29 }
  0x14   :  { %p1247_p8 = por %p1246_p7, %p1245_p6 }
  0x16   :  { %p1248_p9 = pnand %p1247_p8, %p1241_p5 }
  0x18   :  { %1251 = shalt.err (!%p1248_p9)
}
  0x19   :  { %23 = dma.hbm_to_vmem [thread:$0]  %s1377_s0, 256, %s21_s26, [#allocation3]  }
  0x1a   :  { %s1260_s7 = scalar_lea.vmem %s43_s28, 64  ;;  %p1265_p11 = scmp.lt.s32.totalorder %s43_s28, %s43_s28 }
  0x1b   :  { %p1261_p10 = scmp.ne.s32.totalorder %s43_s28, %s1260_s7  ;;  %p1266_p12 = scmp.lt.s32.totalorder %s1260_s7, %s1260_s7 }
  0x1d   :  { %p1267_p13 = por %p1266_p12, %p1265_p11 }
  0x1f   :  { %p1268_p0 = pnand %p1267_p13, %p1261_p10 }
  0x21   :  { %1271 = shalt.err (!%p1268_p0)
}
  0x22   :  { %45 = dma.hbm_to_vmem [thread:$0]  %s1379_s2, 64, %s43_s28, [#allocation6]  }
  0x23   :  { %s1325_s9 = smov [#allocation8]  }
  0x24   :  { %s51_s10 = sshll.u32 %s1325_s9, 4  ;;  %s52_s10 = int_to_ptr.vmem [resolvable:$true] %s51_s10 }
  0x25   :  { %s1280_s11 = scalar_lea.vmem %s52_s10, 4096  ;;  %p1285_p2 = scmp.lt.s32.totalorder %s52_s10, %s52_s10 }
  0x26   :  { %p1281_p1 = scmp.ne.s32.totalorder %s52_s10, %s1280_s11  ;;  %p1286_p3 = scmp.lt.s32.totalorder %s1280_s11, %s1280_s11 }
  0x28   :  { %p1287_p4 = por %p1286_p3, %p1285_p2 }
  0x2a   :  { %p1288_p5 = pnand %p1287_p4, %p1281_p1 }
  0x2c   :  { %1291 = shalt.err (!%p1288_p5)
}
  0x2d   :  { %s1326_s0 = smov 64   ;;  %s1327_s12 = smov 4  }
  0x2e   :  { %57 = dma.hbm_to_vmem [thread:$0]  %s1380_s3, 4096, %s52_s10, [#allocation9], %s1326_s0, %s1326_s0, %s1327_s12  }
  0x2f   :  { %1312 = dma.done.wait [#allocation3], 256  }
  0x30   :  { %1313 = vsyncadd [#allocation3], 4294967040 }
  0x31   :  { %1314 = dma.done.wait [#allocation6], 8256  }
  0x32   :  { %1315 = vsyncadd [#allocation6], 4294959040 }
  0x33   :  { %1316 = dma.done.wait [#allocation9], 4096  }
  0x34   :  { %1317 = vsyncadd [#allocation9], 4294963200  ;;  %v1084_v0 = vld [vmem:[#allocation5 + $0xe4] ss:$16 sps:$4 sm:$0xff]   ;;  %v1086_v1 = vld [vmem:[#allocation5 + $0xec] ss:$16 sps:$4 sm:$0xff]  }
  0x35   :  { %483 = vmatprep.subr.bf16.mxu0 %v1084_v0  ;;  %v1088_v2 = vld [vmem:[#allocation5 + $0xe0] ss:$16 sps:$4 sm:$0xff]   ;;  %v1089_v3 = vld [vmem:[#allocation5 + $0xe8] ss:$16 sps:$4 sm:$0xff]   ;;  %524 = vmatprep.subr.bf16.mxu1 %v1086_v1  ;;  %v1090_v4 = vld [vmem:[#allocation5 + $0xc4] ss:$16 sps:$4 sm:$0xff]  }
  0x36   :  { %484 = vmatpush1.bf16.msra.mxu0 %v1088_v2  ;;  %525 = vmatpush1.bf16.msra.mxu1 %v1089_v3  ;;  %v1092_v5 = vld [vmem:[#allocation5 + $0xcc] ss:$16 sps:$4 sm:$0xff]   ;;  %v1094_v6 = vld [vmem:[#allocation5 + $0xc0] ss:$16 sps:$4 sm:$0xff]   ;;  %v1095_v7 = vld [vmem:[#allocation5 + $0xc8] ss:$16 sps:$4 sm:$0xff]  }
  0x37   :  { %485 = vmatprep.subr.bf16.mxu0 %v1090_v4  ;;  %526 = vmatprep.subr.bf16.mxu1 %v1092_v5  ;;  %v1096_v8 = vld [vmem:[#allocation5 + $0xa4] ss:$16 sps:$4 sm:$0xff]   ;;  %v1098_v9 = vld [vmem:[#allocation5 + $0xac] ss:$16 sps:$4 sm:$0xff]   ;;  %v1100_v10 = vld [vmem:[#allocation5 + $0xa0] ss:$16 sps:$4 sm:$0xff]  }
  0x38   :  { %v1101_v11 = vld [vmem:[#allocation5 + $0xa8] ss:$16 sps:$4 sm:$0xff]   ;;  %v1102_v12 = vld [vmem:[#allocation5 + $0x84] ss:$16 sps:$4 sm:$0xff]   ;;  %v1104_v13 = vld [vmem:[#allocation5 + $0x8c] ss:$16 sps:$4 sm:$0xff]  }
  0x39   :  { %v1106_v14 = vld [vmem:[#allocation5 + $0x80] ss:$16 sps:$4 sm:$0xff]   ;;  %v1107_v15 = vld [vmem:[#allocation5 + $0x88] ss:$16 sps:$4 sm:$0xff]   ;;  %v1108_v16 = vld [vmem:[#allocation5 + $0x64] ss:$16 sps:$4 sm:$0xff]  }
  0x3a   :  { %486 = vmatpush1.bf16.msra.mxu0 %v1094_v6  ;;  %527 = vmatpush1.bf16.msra.mxu1 %v1095_v7  ;;  %v1110_v17 = vld [vmem:[#allocation5 + $0x6c] ss:$16 sps:$4 sm:$0xff]   ;;  %v1112_v18 = vld [vmem:[#allocation5 + $0x60] ss:$16 sps:$4 sm:$0xff]   ;;  %v1113_v19 = vld [vmem:[#allocation5 + $0x68] ss:$16 sps:$4 sm:$0xff]  }
  0x3b   :  { %487 = vmatprep.subr.bf16.mxu0 %v1096_v8  ;;  %528 = vmatprep.subr.bf16.mxu1 %v1098_v9  ;;  %v1114_v20 = vld [vmem:[#allocation5 + $0x44] ss:$16 sps:$4 sm:$0xff]   ;;  %v1116_v21 = vld [vmem:[#allocation5 + $0x4c] ss:$16 sps:$4 sm:$0xff]   ;;  %v1118_v22 = vld [vmem:[#allocation5 + $0x40] ss:$16 sps:$4 sm:$0xff]  }
  0x3c   :  { %v1119_v23 = vld [vmem:[#allocation5 + $0x48] ss:$16 sps:$4 sm:$0xff]   ;;  %v1120_v24 = vld [vmem:[#allocation5 + $0x24] ss:$16 sps:$4 sm:$0xff]   ;;  %v1122_v25 = vld [vmem:[#allocation5 + $0x2c] ss:$16 sps:$4 sm:$0xff]  }
  0x3d   :  { %v1124_v26 = vld [vmem:[#allocation5 + $0x20] ss:$16 sps:$4 sm:$0xff]   ;;  %v1125_v27 = vld [vmem:[#allocation5 + $0x28] ss:$16 sps:$4 sm:$0xff]   ;;  %v1126_v28 = vld [vmem:[#allocation5 + $0x4] ss:$16 sps:$4 sm:$0xff]  }
  0x3e   :  { %488 = vmatpush1.bf16.msra.mxu0 %v1100_v10  ;;  %529 = vmatpush1.bf16.msra.mxu1 %v1101_v11  ;;  %v1128_v29 = vld [vmem:[#allocation5 + $0xc] ss:$16 sps:$4 sm:$0xff]   ;;  %v1130_v30 = vld [vmem:[#allocation5] ss:$16 sps:$4 sm:$0xff]   ;;  %v1131_v31 = vld [vmem:[#allocation5 + $0x8] ss:$16 sps:$4 sm:$0xff]  }
  0x3f   :  { %489 = vmatprep.subr.bf16.mxu0 %v1102_v12  ;;  %530 = vmatprep.subr.bf16.mxu1 %v1104_v13  ;;  %v1132_v32 = vld [vmem:[#allocation5 + $0x1e4] ss:$16 sps:$4 sm:$0xff]   ;;  %v1134_v33 = vld [vmem:[#allocation5 + $0x1ec] ss:$16 sps:$4 sm:$0xff]   ;;  %v1136_v34 = vld [vmem:[#allocation5 + $0x1e0] ss:$16 sps:$4 sm:$0xff]  }
  0x40   :  { %v1137_v35 = vld [vmem:[#allocation5 + $0x1e8] ss:$16 sps:$4 sm:$0xff]   ;;  %v1138_v36 = vld [vmem:[#allocation5 + $0x1c4] ss:$16 sps:$4 sm:$0xff]   ;;  %v1140_v37 = vld [vmem:[#allocation5 + $0x1cc] ss:$16 sps:$4 sm:$0xff]  }
  0x41   :  { %v1142_v38 = vld [vmem:[#allocation5 + $0x1c0] ss:$16 sps:$4 sm:$0xff]   ;;  %v1143_v39 = vld [vmem:[#allocation5 + $0x1c8] ss:$16 sps:$4 sm:$0xff]   ;;  %v1144_v40 = vld [vmem:[#allocation5 + $0x1a4] ss:$16 sps:$4 sm:$0xff]  }
  0x42   :  { %490 = vmatpush1.bf16.msra.mxu0 %v1106_v14  ;;  %531 = vmatpush1.bf16.msra.mxu1 %v1107_v15  ;;  %v1146_v41 = vld [vmem:[#allocation5 + $0x1ac] ss:$16 sps:$4 sm:$0xff]   ;;  %v1148_v42 = vld [vmem:[#allocation5 + $0x1a0] ss:$16 sps:$4 sm:$0xff]   ;;  %v1149_v43 = vld [vmem:[#allocation5 + $0x1a8] ss:$16 sps:$4 sm:$0xff]  }
  0x43   :  { %491 = vmatprep.subr.bf16.mxu0 %v1108_v16  ;;  %532 = vmatprep.subr.bf16.mxu1 %v1110_v17  ;;  %v1150_v44 = vld [vmem:[#allocation5 + $0x184] ss:$16 sps:$4 sm:$0xff]   ;;  %v1152_v45 = vld [vmem:[#allocation5 + $0x18c] ss:$16 sps:$4 sm:$0xff]   ;;  %v1154_v46 = vld [vmem:[#allocation5 + $0x180] ss:$16 sps:$4 sm:$0xff]  }
  0x44   :  { %v74_v47 = vld [vmem:[#allocation2 + $0x8] sm:$0xff]  ;;  %v1156_v50 = vld [vmem:[#allocation5 + $0x164] ss:$16 sps:$4 sm:$0xff]   ;;  %v1160_v52 = vld [vmem:[#allocation5 + $0x160] ss:$16 sps:$4 sm:$0xff]   ;;  %s1328_s15 = smov [#allocation10]  }
  0x45   :  { %v1155_v48 = vld [vmem:[#allocation5 + $0x188] ss:$16 sps:$4 sm:$0xff]   ;;  %v76_v49 = vpack.c.bf16 %v74_v47, %v74_v47  ;;  %v1158_v51 = vld [vmem:[#allocation5 + $0x16c] ss:$16 sps:$4 sm:$0xff]   ;;  %v1162_v54 = vld [vmem:[#allocation5 + $0x144] ss:$16 sps:$4 sm:$0xff]  }
  0x46   :  { %492 = vmatpush1.bf16.msra.mxu0 %v1112_v18  ;;  %533 = vmatpush1.bf16.msra.mxu1 %v1113_v19  ;;  %v1161_v53 = vld [vmem:[#allocation5 + $0x168] ss:$16 sps:$4 sm:$0xff]   ;;  %v1164_v55 = vld [vmem:[#allocation5 + $0x14c] ss:$16 sps:$4 sm:$0xff]   ;;  %v1166_v56 = vld [vmem:[#allocation5 + $0x140] ss:$16 sps:$4 sm:$0xff]  }
  0x47   :  { %493 = vmatprep.subr.bf16.mxu0 %v1114_v20  ;;  %534 = vmatprep.subr.bf16.mxu1 %v1116_v21  ;;  %v1167_v57 = vld [vmem:[#allocation5 + $0x148] ss:$16 sps:$4 sm:$0xff]   ;;  %v1168_v58 = vld [vmem:[#allocation5 + $0x124] ss:$16 sps:$4 sm:$0xff]   ;;  %v1170_v59 = vld [vmem:[#allocation5 + $0x12c] ss:$16 sps:$4 sm:$0xff]  }
  0x48   :  { %515 = vmatprep.mubr.bf16.mxu0 %v76_v49  ;;  %556 = vmatprep.mubr.bf16.mxu1 %v76_v49  ;;  %v1172_v60 = vld [vmem:[#allocation5 + $0x120] ss:$16 sps:$4 sm:$0xff]   ;;  %v1173_v61 = vld [vmem:[#allocation5 + $0x128] ss:$16 sps:$4 sm:$0xff]   ;;  %v1174_v62 = vld [vmem:[#allocation5 + $0x104] ss:$16 sps:$4 sm:$0xff]  }
  0x49   :  { %v1176_v63 = vld [vmem:[#allocation5 + $0x10c] ss:$16 sps:$4 sm:$0xff]   ;;  %v1178_v0 = vld [vmem:[#allocation5 + $0x100] ss:$16 sps:$4 sm:$0xff]   ;;  %v1179_v1 = vld [vmem:[#allocation5 + $0x108] ss:$16 sps:$4 sm:$0xff]  }
  0x4a   :  { %494 = vmatpush1.bf16.msra.mxu0 %v1118_v22  ;;  %535 = vmatpush1.bf16.msra.mxu1 %v1119_v23  ;;  %v73_v2 = vld [vmem:[#allocation2] sm:$0xff]  ;;  %v1180_v3 = vld [vmem:[#allocation8 + $0x78] sm:$0xff]   ;;  %v1192_v16 = vld [vmem:[#allocation8 + $0x60] sm:$0xff]   ;;  %s923_s16 = sshll.u32 %s1328_s15, 4  ;;  %s924_s16 = int_to_ptr.vmem [resolvable:$true] %s923_s16 }
  0x4b   :  { %495 = vmatprep.subr.bf16.mxu0 %v1120_v24  ;;  %536 = vmatprep.subr.bf16.mxu1 %v1122_v25  ;;  %v1181_v4 = vld [vmem:[#allocation8 + $0xf8] sm:$0xff]   ;;  %v75_v6 = vpack.c.bf16 %v73_v2, %v73_v2  ;;  %v1184_v8 = vld [vmem:[#allocation8 + $0x70] sm:$0xff]   ;;  %v1188_v12 = vld [vmem:[#allocation8 + $0x68] sm:$0xff]   ;;  %s1292_s17 = scalar_lea.vmem %s924_s16, 128  ;;  %p1297_p7 = scmp.lt.s32.totalorder %s924_s16, %s924_s16 }
  0x4c   :  { %v1182_v5 = vld [vmem:[#allocation8 + $0x38] sm:$0xff]   ;;  %v1185_v9 = vld [vmem:[#allocation8 + $0xf0] sm:$0xff]   ;;  %v1189_v13 = vld [vmem:[#allocation8 + $0xe8] sm:$0xff]   ;;  %p1293_p6 = scmp.ne.s32.totalorder %s924_s16, %s1292_s17  ;;  %p1298_p8 = scmp.lt.s32.totalorder %s1292_s17, %s1292_s17 }
  0x4d   :  { %v1183_v7 = vld [vmem:[#allocation8 + $0xb8] sm:$0xff]   ;;  %v1186_v10 = vld [vmem:[#allocation8 + $0x30] sm:$0xff]   ;;  %v1190_v14 = vld [vmem:[#allocation8 + $0x28] sm:$0xff]  }
  0x4e   :  { %496 = vmatpush1.bf16.msra.mxu0 %v1124_v26  ;;  %537 = vmatpush1.bf16.msra.mxu1 %v1125_v27  ;;  %v1187_v11 = vld [vmem:[#allocation8 + $0xb0] sm:$0xff]   ;;  %v1191_v15 = vld [vmem:[#allocation8 + $0xa8] sm:$0xff]   ;;  %v1193_v17 = vld [vmem:[#allocation8 + $0xe0] sm:$0xff]   ;;  %p1299_p9 = por %p1298_p8, %p1297_p7 }
  0x4f   :  { %497 = vmatprep.subr.bf16.mxu0 %v1126_v28  ;;  %538 = vmatprep.subr.bf16.mxu1 %v1128_v29  ;;  %v1194_v18 = vld [vmem:[#allocation8 + $0x20] sm:$0xff]   ;;  %v1196_v20 = vld [vmem:[#allocation8 + $0x58] sm:$0xff]   ;;  %v1200_v24 = vld [vmem:[#allocation8 + $0x50] sm:$0xff]  }
  0x50   :  { %v1195_v19 = vld [vmem:[#allocation8 + $0xa0] sm:$0xff]   ;;  %v1197_v21 = vld [vmem:[#allocation8 + $0xd8] sm:$0xff]   ;;  %v1201_v25 = vld [vmem:[#allocation8 + $0xd0] sm:$0xff]   ;;  %p1300_p10 = pnand %p1299_p9, %p1293_p6 }
  0x51   :  { %v1198_v22 = vld [vmem:[#allocation8 + $0x18] sm:$0xff]   ;;  %v1202_v26 = vld [vmem:[#allocation8 + $0x10] sm:$0xff]   ;;  %v1204_v28 = vld [vmem:[#allocation8 + $0x48] sm:$0xff]  }
  0x52   :  { %498 = vmatpush1.bf16.msra.mxu0 %v1130_v30  ;;  %539 = vmatpush1.bf16.msra.mxu1 %v1131_v31  ;;  %v1199_v23 = vld [vmem:[#allocation8 + $0x98] sm:$0xff]   ;;  %v1203_v27 = vld [vmem:[#allocation8 + $0x90] sm:$0xff]   ;;  %v1205_v29 = vld [vmem:[#allocation8 + $0xc8] sm:$0xff]  }
  0x53   :  { %499 = vmatprep.subr.bf16.mxu0 %v1132_v32  ;;  %540 = vmatprep.subr.bf16.mxu1 %v1134_v33  ;;  %v1206_v30 = vld [vmem:[#allocation8 + $0x8] sm:$0xff]   ;;  %v1208_v32 = vld [vmem:[#allocation8 + $0x40] sm:$0xff]  }
  0x54   :  { %v1207_v31 = vld [vmem:[#allocation8 + $0x88] sm:$0xff]   ;;  %v1209_v33 = vld [vmem:[#allocation8 + $0xc0] sm:$0xff]  }
  0x56   :  { %500 = vmatpush2.bf16.msra.mxu0 %v1136_v34  ;;  %541 = vmatpush2.bf16.msra.mxu1 %v1137_v35  ;;  %v1210_v34 = vld [vmem:[#allocation8] sm:$0xff]  }
  0x57   :  { %501 = vmatprep.subr.bf16.mxu0 %v1138_v36  ;;  %542 = vmatprep.subr.bf16.mxu1 %v1140_v37  ;;  %v1211_v35 = vld [vmem:[#allocation8 + $0x80] sm:$0xff]   ;;  %v143_v36 = vlaneseq }
  0x59   :  { %v144_v37 = vshrl.u32 %v143_v36, 7 }
  0x5a   :  { %502 = vmatpush2.bf16.msra.mxu0 %v1142_v38  ;;  %543 = vmatpush2.bf16.msra.mxu1 %v1143_v39 }
  0x5b   :  { %503 = vmatprep.subr.bf16.mxu0 %v1144_v40  ;;  %544 = vmatprep.subr.bf16.mxu1 %v1146_v41  ;;  %v145_v38 = vsub.s32 0, %v144_v37  ;;  %v153_v39 = vsub.s32 2, %v144_v37  ;;  %v141_v40 = vld [vmem:[#allocation7] sm:$0xf]  ;;  %v149_v41 = vsub.s32 1, %v144_v37 }
  0x5e   :  { %504 = vmatpush2.bf16.msra.mxu0 %v1148_v42  ;;  %545 = vmatpush2.bf16.msra.mxu1 %v1149_v43  ;;  %v157_v42 = vsub.s32 3, %v144_v37  ;;  %v146_v43 = vrot.slane %v141_v40, %v145_v38 }
  0x5f   :  { %505 = vmatprep.subr.bf16.mxu0 %v1150_v44  ;;  %546 = vmatprep.subr.bf16.mxu1 %v1152_v45  ;;  %v154_v44 = vrot.slane %v141_v40, %v153_v39  ;;  %v150_v45 = vrot.slane %v141_v40, %v149_v41 }
  0x62   :  { %506 = vmatpush2.bf16.msra.mxu0 %v1154_v46  ;;  %547 = vmatpush2.bf16.msra.mxu1 %v1155_v48  ;;  %v158_v46 = vrot.slane %v141_v40, %v157_v42 }
  0x63   :  { %507 = vmatprep.subr.bf16.mxu0 %v1156_v50  ;;  %548 = vmatprep.subr.bf16.mxu1 %v1158_v51 }
  0x66   :  { %508 = vmatpush2.bf16.msra.mxu0 %v1160_v52  ;;  %549 = vmatpush2.bf16.msra.mxu1 %v1161_v53 }
  0x67   :  { %509 = vmatprep.subr.bf16.mxu0 %v1162_v54  ;;  %550 = vmatprep.subr.bf16.mxu1 %v1164_v55 }
  0x6a   :  { %510 = vmatpush2.bf16.msra.mxu0 %v1166_v56  ;;  %551 = vmatpush2.bf16.msra.mxu1 %v1167_v57 }
  0x6b   :  { %511 = vmatprep.subr.bf16.mxu0 %v1168_v58  ;;  %552 = vmatprep.subr.bf16.mxu1 %v1170_v59 }
  0x6e   :  { %512 = vmatpush2.bf16.msra.mxu0 %v1172_v60  ;;  %553 = vmatpush2.bf16.msra.mxu1 %v1173_v61 }
  0x6f   :  { %513 = vmatprep.subr.bf16.mxu0 %v1174_v62  ;;  %554 = vmatprep.subr.bf16.mxu1 %v1176_v63 }
  0x72   :  { %514 = vmatpush2.bf16.msra.mxu0 %v1178_v0  ;;  %555 = vmatpush2.bf16.msra.mxu1 %v1179_v1 }
  0x73   :  { %1031 = vmatprep.subr.bf16.mxu0 %v1180_v3  ;;  %1053 = vmatprep.subr.bf16.mxu1 %v1181_v4 }
  0x75   :  { %516 = vmatmul.mubr.bf16.vlgmr.msra.gmra.mxu0 %v75_v6  ;;  %557 = vmatmul.mubr.bf16.vlgmr.msra.gmra.mxu1 %v75_v6 }
  0x76   :  { %1032 = vmatpush3.bf16.msra.mxu0 %v1182_v5  ;;  %1054 = vmatpush3.bf16.msra.mxu1 %v1183_v7  ;;  %v998_v5 = vld [vmem:[%s1381_s4] ss:$0 sm:$0xff] }
  0x77   :  { %1033 = vmatprep.subr.bf16.mxu0 %v1184_v8  ;;  %1055 = vmatprep.subr.bf16.mxu1 %v1185_v9 }
  0x7a   :  { %1034 = vmatpush3.bf16.msra.mxu0 %v1186_v10  ;;  %1056 = vmatpush3.bf16.msra.mxu1 %v1187_v11 }
  0x7b   :  { %1035 = vmatprep.subr.bf16.mxu0 %v1188_v12  ;;  %1057 = vmatprep.subr.bf16.mxu1 %v1189_v13 }
  0x7e   :  { %1036 = vmatpush3.bf16.msra.mxu0 %v1190_v14  ;;  %1058 = vmatpush3.bf16.msra.mxu1 %v1191_v15 }
  0x7f   :  { %1037 = vmatprep.subr.bf16.mxu0 %v1192_v16  ;;  %1059 = vmatprep.subr.bf16.mxu1 %v1193_v17 }
  0x82   :  { %1038 = vmatpush3.bf16.msra.mxu0 %v1194_v18  ;;  %1060 = vmatpush3.bf16.msra.mxu1 %v1195_v19 }
  0x83   :  { %1039 = vmatprep.subr.bf16.mxu0 %v1196_v20  ;;  %1061 = vmatprep.subr.bf16.mxu1 %v1197_v21 }
  0x86   :  { %1040 = vmatpush3.bf16.msra.mxu0 %v1198_v22  ;;  %1062 = vmatpush3.bf16.msra.mxu1 %v1199_v23 }
  0x87   :  { %1041 = vmatprep.subr.bf16.mxu0 %v1200_v24  ;;  %1063 = vmatprep.subr.bf16.mxu1 %v1201_v25 }
  0x8a   :  { %1042 = vmatpush3.bf16.msra.mxu0 %v1202_v26  ;;  %1064 = vmatpush3.bf16.msra.mxu1 %v1203_v27 }
  0x8b   :  { %1043 = vmatprep.subr.bf16.mxu0 %v1204_v28  ;;  %1065 = vmatprep.subr.bf16.mxu1 %v1205_v29 }
  0x8e   :  { %1044 = vmatpush3.bf16.msra.mxu0 %v1206_v30  ;;  %1066 = vmatpush3.bf16.msra.mxu1 %v1207_v31 }
  0x8f   :  { %1045 = vmatprep.subr.bf16.mxu0 %v1208_v32  ;;  %1067 = vmatprep.subr.bf16.mxu1 %v1209_v33 }
  0x92   :  { %1046 = vmatpush3.bf16.msra.mxu0 %v1210_v34  ;;  %1068 = vmatpush3.bf16.msra.mxu1 %v1211_v35 }
 0x135   :  { %v517_v47 = vpop.f32.mrf.mxu0  ;;  %v558_v48 = vpop.f32.mrf.mxu1 }
 0x136   :  { %v518_v49 = vadd.f32 %v517_v47, %v146_v43  ;;  %v559_v50 = vadd.f32 %v558_v48, %v154_v44 }
 0x137   :  { %v519_v51 = vpop.f32.mrf.mxu0  ;;  %v560_v52 = vpop.f32.mrf.mxu1 }
 0x138   :  { %v567_v53 = vmax.f32 %v559_v50, 0.0  ;;  %v520_v54 = vadd.f32 %v519_v51, %v150_v45  ;;  %v561_v55 = vadd.f32 %v560_v52, %v158_v46  ;;  %v565_v56 = vmax.f32 %v518_v49, 0.0 }
 0x139   :  { %v521_v57 = vpop.f32.mrf.mxu0  ;;  %v562_v58 = vpop.f32.mrf.mxu1 }
 0x13a   :  { %v566_v59 = vmax.f32 %v520_v54, 0.0  ;;  %v568_v60 = vmax.f32 %v561_v55, 0.0  ;;  %v571_v61 = vpack.c.bf16 %v567_v53, %v567_v53  ;;  %v569_v2 = vpack.c.bf16 %v565_v56, %v565_v56 }
 0x13b   :  { %v522_v62 = vpop.f32.mrf.mxu0  ;;  %v563_v63 = vpop.f32.mrf.mxu1 }
 0x13c   :  { %v570_v0 = vpack.c.bf16 %v566_v59, %v566_v59  ;;  %v572_v1 = vpack.c.bf16 %v568_v60, %v568_v60 }
 0x13e   :  { %868 = vmatprep.mubr.bf16.mxu0 %v570_v0  ;;  %908 = vmatprep.mubr.bf16.mxu1 %v572_v1 }
 0x13f   :  { %869 = vmatmul.mubr.bf16.vlgmr.msra.gmra.mxu0 %v569_v2  ;;  %909 = vmatmul.mubr.bf16.vlgmr.msra.gmra.mxu1 %v571_v61 }
 0x1ff   :  { %v1047_v3 = vpop.f32.mrf.mxu0  ;;  %v1069_v4 = vpop.f32.mrf.mxu1 }
 0x201   :  { %v1048_v6 = vpop.f32.mrf.mxu0  ;;  %v1070_v7 = vpop.f32.mrf.mxu1 }
 0x202   :  { %v1049_v8 = vadd.f32 %v1048_v6, %v1047_v3  ;;  %v1071_v12 = vadd.f32 %v1070_v7, %v1069_v4 }
 0x203   :  { %v1050_v9 = vpop.f32.mrf.mxu0  ;;  %v1072_v10 = vpop.f32.mrf.mxu1 }
 0x204   :  { %v871_v11 = vadd.f32 %v1049_v8, %v998_v5 }
 0x205   :  { %v1051_v13 = vpop.f32.mrf.mxu0  ;;  %v1073_v14 = vpop.f32.mrf.mxu1 }
 0x206   :  { %v911_v15 = vadd.f32 %v1071_v12, %v871_v11 }
 0x208   :  { %916 = vst [vmem:[#allocation10] sm:$0xff] %v911_v15 }
 0x209   :  { %1303 = shalt.err (!%p1300_p10)
}
 0x20a   :  { %926 = dma.vmem_to_hbm [thread:$0]  %s924_s16, 128, %s1382_s5, [#allocation4]  }
 0x20b   :  { %1318 = dma.done.wait [#allocation4], 128  }
 0x20c   :  { %1319 = vsyncadd [#allocation4], 4294967168 }
 0x20d   :  { %930 = vsyncpa [#allocation3], 1 }
 0x20e   :  { %931 = vsyncpa [#allocation6], 1 }
 0x20f   :  { %932 = vsyncpa [#allocation9], 1 }
 0x210   :  { %933 = vsyncpa [#allocation4], 1 }

</bundles_post_ra>
